<compile_context>
chip_gen: v7x
topology: tpu7x:2x2x1
jax: 0.10.0
libtpu: 0.0.40
codegen_flags: <defaults>
</compile_context>

<pallas_src>
import jax
import jax.numpy as jnp
from jax.experimental import pallas as pl
from jax.experimental.pallas import tpu as pltpu


def light_attention_kernel(cols_ref, bias_ref, wfa_ref, bfa_ref,
                           o1_ref, o2_ref, raw_ref, attn_ref):
    Bb, E, L = raw_ref.shape

    # Single fused conv matmul for the whole batch block:
    #   [wf; wa] (2E, K*E) bf16  @  im2col slab (K*E, Bb*L) bf16, f32 accumulation.
    oa = jnp.dot(wfa_ref[...], cols_ref[...],
                 preferred_element_type=jnp.float32) + bfa_ref[...]   # (2E, Bb*L) f32
    o_all = oa[:E]                       # feature-conv outputs
    a_all = oa[E:] + bias_ref[...]       # attention-conv outputs + additive mask bias
    # conv_dropout / dropout are identity (inference mode)

    # Per-batch softmax + pooling on lane-tile-aligned slices (L == 128).
    # TODO(synk): for Bb >= 4 switch to a lax.fori_loop over a VMEM scratch to
    # keep the unrolled live ranges bounded.
    for b in range(Bb):
        raw = a_all[:, b * L:(b + 1) * L]          # (E, L)
        o = o_all[:, b * L:(b + 1) * L]            # (E, L)
        raw_ref[b] = raw

        m = jnp.max(raw, axis=-1, keepdims=True)
        e = jnp.exp(raw - m)
        attn = e * pl.reciprocal(jnp.sum(e, axis=-1, keepdims=True), approx=True)
        attn_ref[b] = attn

        o1_ref[b] = jnp.sum(o * attn, axis=-1)     # attention-weighted sum, (E,)
        o2_ref[b] = jnp.max(o, axis=-1)            # max over ALL positions (as in ref), (E,)


def light_attention_forward(x, mask, params, *, batch_block=None):
    """x: [B, E, L] f32, mask: [B, L] bool -> (probs [B,out], raw [B,E,L], attn [B,E,L])"""
    B, E, L = x.shape
    twoE, KE = params["wfa"].shape
    K = KE // E
    pad = K // 2

    if batch_block is None:
        # Even >=2-block grid so both v7x TensorCores get a batch block while
        # N = Bb*L stays a multiple of 256 (fills the 256-wide MXU on v6e/v7x).
        # On single-TC v5e/v6e, pass batch_block=B to remove per-step overhead.
        batch_block = B // 2 if (B >= 4 and B % 2 == 0) else B
    Bb = batch_block
    assert B % Bb == 0
    nblk = B // Bb
    BbL = Bb * L

    # ---- wrapper-side layout plumbing (not compute hoisting) ----------------
    # im2col slab packed per batch block:
    #   cols[n, k*E + c_in, b*L + l] = xpad[n*Bb + b, c_in, l + k]
    xpad = jnp.pad(x, ((0, 0), (0, 0), (pad, pad)))
    cols = jnp.concatenate([xpad[:, :, k:k + L] for k in range(K)], axis=1)     # [B, K*E, L]
    cols = (cols.reshape(nblk, Bb, KE, L)
                .transpose(0, 2, 1, 3)
                .reshape(nblk, KE, BbL)
                .astype(jnp.bfloat16))
    # additive mask bias: 0 where valid, -1e9 where padded
    bias = jnp.where(mask, 0.0, -1000000000.0).astype(jnp.float32).reshape(nblk, 1, BbL)

    blk3 = lambda i: (i, 0, 0)
    full2 = lambda i: (0, 0)

    in_specs = [
        pl.BlockSpec((None, KE, BbL), blk3),       # im2col slab (bf16), lane-aligned per batch elem
        pl.BlockSpec((None, 1, BbL), blk3),        # additive mask bias (f32)
        pl.BlockSpec((twoE, KE), full2),           # fused [feature; attention] conv weight (bf16)
        pl.BlockSpec((twoE, 1), full2),            # fused conv bias (f32)
    ]
    out_specs = [
        pl.BlockSpec((None, Bb, E), blk3),         # o1: attention-weighted sum, lane-dense in E
        pl.BlockSpec((None, Bb, E), blk3),         # o2: max pool
        pl.BlockSpec((Bb, E, L), blk3),            # raw attention
        pl.BlockSpec((Bb, E, L), blk3),            # attention
    ]
    out_shape = (
        jax.ShapeDtypeStruct((nblk, Bb, E), jnp.float32),
        jax.ShapeDtypeStruct((nblk, Bb, E), jnp.float32),
        jax.ShapeDtypeStruct((B, E, L), jnp.float32),
        jax.ShapeDtypeStruct((B, E, L), jnp.float32),
    )

    o1b, o2b, raw, attn = pl.pallas_call(
        light_attention_kernel,
        out_shape=out_shape,
        grid_spec=pltpu.PrefetchScalarGridSpec(
            num_scalar_prefetch=0,
            grid=(nblk,),
            in_specs=in_specs,
            out_specs=out_specs,
        ),
        compiler_params=pltpu.CompilerParams(
            dimension_semantics=("parallel",),      # batch-block axis -> megacore sharding (v7x)
            vmem_limit_bytes=32 * 1024 * 1024,
        ),
    )(cols, bias, params["wfa"], params["bfa"])

    # ---- tiny MLP head (~4K FLOPs) stays in XLA: lane-dense, exact softmax --
    pooled = jnp.concatenate([o1b.reshape(B, E), o2b.reshape(B, E)], axis=-1)   # [B, 2E]
    h = jnp.maximum(pooled @ params["w1"].T + params["b1"], 0.0)
    h = h * params["bn_scale"] + params["bn_shift"]        # eval-mode BatchNorm1d (pre-folded)
    logits = h @ params["w2"].T + params["b2"]
    probs = jax.nn.softmax(logits, axis=-1)                # exact divide for class probabilities
    return probs, raw, attn


def make_params(key, E, K, H, out_dim):
    ks = jax.random.split(key, 8)
    scale_c = 1.0 / jnp.sqrt(E * K)
    wf_t = jax.random.normal(ks[0], (E, E, K), jnp.float32) * scale_c   # [out, in, K] (PyTorch layout)
    wa_t = jax.random.normal(ks[1], (E, E, K), jnp.float32) * scale_c
    bf = jax.random.normal(ks[2], (E,), jnp.float32) * scale_c
    ba = jax.random.normal(ks[3], (E,), jnp.float32) * scale_c
    w1 = jax.random.normal(ks[4], (H, 2 * E), jnp.float32) * (1.0 / jnp.sqrt(2 * E))
    b1 = jax.random.normal(ks[5], (H,), jnp.float32) * 0.01
    w2 = jax.random.normal(ks[6], (out_dim, H), jnp.float32) * (1.0 / jnp.sqrt(H))
    b2 = jax.random.normal(ks[7], (out_dim,), jnp.float32) * 0.01
    gamma = jnp.ones((H,), jnp.float32)
    beta = jnp.zeros((H,), jnp.float32)
    mean = jnp.zeros((H,), jnp.float32)
    var = jnp.ones((H,), jnp.float32)

    # im2col-fused conv weight: wfa[c_out, k*E + c_in] = w[c_out, c_in, k]
    wf_flat = jnp.transpose(wf_t, (0, 2, 1)).reshape(E, K * E)
    wa_flat = jnp.transpose(wa_t, (0, 2, 1)).reshape(E, K * E)
    bn_scale = gamma * jax.lax.rsqrt(var + 1e-5)
    bn_shift = beta - mean * bn_scale

    params = {
        "wfa": jnp.concatenate([wf_flat, wa_flat], axis=0).astype(jnp.bfloat16),
        "bfa": jnp.concatenate([bf, ba], axis=0)[:, None],
        "w1": w1, "b1": b1, "bn_scale": bn_scale, "bn_shift": bn_shift,
        "w2": w2, "b2": b2,
    }
    torch_like = {"wf_t": wf_t, "wa_t": wa_t, "bf": bf, "ba": ba,
                  "w1": w1, "b1": b1, "w2": w2, "b2": b2,
                  "gamma": gamma, "beta": beta, "mean": mean, "var": var}
    return params, torch_like


def ref_forward(x, mask, tp):
    """Pure-JAX f32 reference replicating the PyTorch forward (eval mode)."""
    B, E, L = x.shape
    K = tp["wf_t"].shape[-1]
    pad = K // 2
    xpad = jnp.pad(x, ((0, 0), (0, 0), (pad, pad)))

    def conv(w, b):
        acc = jnp.zeros((B, E, L), jnp.float32)
        for k in range(K):
            acc = acc + jnp.einsum("oi,bil->bol", w[:, :, k], xpad[:, :, k:k + L])
        return acc + b[None, :, None]

    o = conv(tp["wf_t"], tp["bf"])
    raw = conv(tp["wa_t"], tp["ba"])
    raw = jnp.where(mask[:, None, :], raw, -1000000000.0)
    attn = jax.nn.softmax(raw, axis=-1)
    o1 = jnp.sum(o * attn, axis=-1)
    o2 = jnp.max(o, axis=-1)
    oc = jnp.concatenate([o1, o2], axis=-1)
    h = jnp.maximum(oc @ tp["w1"].T + tp["b1"], 0.0)
    h = (h - tp["mean"]) * tp["gamma"] * jax.lax.rsqrt(tp["var"] + 1e-5) + tp["beta"]
    logits = h @ tp["w2"].T + tp["b2"]
    return jax.nn.softmax(logits, axis=-1), raw, attn


if __name__ == "__main__":
    B, E, L = 4, 32, 128
    K, H, OUT = 9, 32, 2

    key = jax.random.PRNGKey(0)
    kx, kp = jax.random.split(key)
    x = jax.random.normal(kx, (B, E, L), jnp.float32)
    lengths = jnp.array([L, 100, 64, 37], jnp.int32)
    mask = jnp.arange(L)[None, :] < lengths[:, None]   # [B, L] bool

    params, torch_like = make_params(kp, E, K, H, OUT)

    # default batch_block -> Bb=2, grid=(2,) "parallel" (both v7x TCs; N=256 fills v6e/v7x MXU)
    probs, raw, attn = light_attention_forward(x, mask, params)
    jax.block_until_ready((probs, raw, attn))

    probs_r, raw_r, attn_r = ref_forward(x, mask, torch_like)
    assert probs.shape == (B, OUT) and raw.shape == (B, E, L) and attn.shape == (B, E, L)
    # Tolerances account for bf16 conv operands (f32 accumulation) vs. the pure-f32
    # reference, and for the additive (-1e9) mask bias vs. exact masked_fill on `raw`.
    assert jnp.allclose(probs, probs_r, atol=5e-3, rtol=5e-3)
    assert jnp.allclose(raw, raw_r, atol=5e-2, rtol=2e-2)
    assert jnp.allclose(attn, attn_r, atol=5e-3, rtol=5e-3)

    print("KERNEL_OK")
</pallas_src>

<mosaic_0001>
module attributes {stable_mosaic.version = 11 : i64} {
  func.func @light_attention_kernel(%arg0: i32, %arg1: memref<1x288x256xbf16, #tpu.memory_space<vmem>>, %arg2: memref<1x1x256xf32, #tpu.memory_space<vmem>>, %arg3: memref<64x288xbf16, #tpu.memory_space<vmem>>, %arg4: memref<64x1xf32, #tpu.memory_space<vmem>>, %arg5: memref<1x2x32xf32, #tpu.memory_space<vmem>>, %arg6: memref<1x2x32xf32, #tpu.memory_space<vmem>>, %arg7: memref<2x32x128xf32, #tpu.memory_space<vmem>>, %arg8: memref<2x32x128xf32, #tpu.memory_space<vmem>>) attributes {dimension_semantics = [#tpu.dimension_semantics<parallel>], iteration_bounds = array<i64: 2>, scalar_prefetch = 0 : i64, scratch_operands = 0 : i64, tpu.core_type = #tpu.core_type<tc>, window_params = [{transform_indices = @transform_0, window_bounds = array<i64: 1, 288, 256>}, {transform_indices = @transform_1, window_bounds = array<i64: 1, 1, 256>}, {pipeline_mode = #tpu.pipeline_mode<synchronous>, transform_indices = @transform_2, window_bounds = array<i64: 64, 288>}, {pipeline_mode = #tpu.pipeline_mode<synchronous>, transform_indices = @transform_3, window_bounds = array<i64: 64, 1>}, {transform_indices = @transform_4, window_bounds = array<i64: 1, 2, 32>}, {transform_indices = @transform_5, window_bounds = array<i64: 1, 2, 32>}, {transform_indices = @transform_6, window_bounds = array<i64: 2, 32, 128>}, {transform_indices = @transform_7, window_bounds = array<i64: 2, 32, 128>}]} {
    %c0 = arith.constant 0 : index
    %c0_0 = arith.constant 0 : index
    %0 = vector.load %arg3[%c0, %c0_0] : memref<64x288xbf16, #tpu.memory_space<vmem>>, vector<64x288xbf16>
    %c0_1 = arith.constant 0 : index
    %c0_2 = arith.constant 0 : index
    %c0_3 = arith.constant 0 : index
    %1 = vector.load %arg1[%c0_1, %c0_2, %c0_3] : memref<1x288x256xbf16, #tpu.memory_space<vmem>>, vector<1x288x256xbf16>
    %2 = vector.shape_cast %1 : vector<1x288x256xbf16> to vector<288x256xbf16>
    %cst = arith.constant dense<0.000000e+00> : vector<64x256xf32>
    %3 = tpu.matmul %0, %2, %cst {dimension_numbers = #tpu.dot_dimension_numbers<[1], [0], [0], [1], [0, 0, 1, 1], [], []>} : vector<64x288xbf16>, vector<288x256xbf16>, vector<64x256xf32> -> vector<64x256xf32>
    %c0_4 = arith.constant 0 : index
    %c0_5 = arith.constant 0 : index
    %4 = vector.load %arg4[%c0_4, %c0_5] : memref<64x1xf32, #tpu.memory_space<vmem>>, vector<64x1xf32>
    %5 = vector.broadcast %4 : vector<64x1xf32> to vector<64x256xf32>
    %6 = arith.addf %3, %5 : vector<64x256xf32>
    %7 = vector.extract_strided_slice %6 {offsets = [0, 0], sizes = [32, 256], strides = [1, 1]} : vector<64x256xf32> to vector<32x256xf32>
    %8 = vector.extract_strided_slice %6 {offsets = [32, 0], sizes = [32, 256], strides = [1, 1]} : vector<64x256xf32> to vector<32x256xf32>
    %c0_6 = arith.constant 0 : index
    %c0_7 = arith.constant 0 : index
    %c0_8 = arith.constant 0 : index
    %9 = vector.load %arg2[%c0_6, %c0_7, %c0_8] : memref<1x1x256xf32, #tpu.memory_space<vmem>>, vector<1x1x256xf32>
    %10 = vector.shape_cast %9 : vector<1x1x256xf32> to vector<1x256xf32>
    %11 = vector.broadcast %10 : vector<1x256xf32> to vector<32x256xf32>
    %12 = arith.addf %8, %11 : vector<32x256xf32>
    %13 = vector.extract_strided_slice %12 {offsets = [0, 0], sizes = [32, 128], strides = [1, 1]} : vector<32x256xf32> to vector<32x128xf32>
    %14 = vector.extract_strided_slice %7 {offsets = [0, 0], sizes = [32, 128], strides = [1, 1]} : vector<32x256xf32> to vector<32x128xf32>
    %c0_9 = arith.constant 0 : index
    %c0_10 = arith.constant 0 : index
    %c0_11 = arith.constant 0 : index
    %15 = vector.load %arg7[%c0_9, %c0_10, %c0_11] : memref<2x32x128xf32, #tpu.memory_space<vmem>>, vector<1x32x128xf32>
    %16 = vector.shape_cast %15 : vector<1x32x128xf32> to vector<32x128xf32>
    %17 = vector.shape_cast %13 : vector<32x128xf32> to vector<1x32x128xf32>
    tpu.vector_store %arg7[%c0_9, %c0_10, %c0_11], %17 {strides = array<i32>} : memref<2x32x128xf32, #tpu.memory_space<vmem>>, vector<1x32x128xf32>,
    %cst_12 = arith.constant dense<0xFF800000> : vector<32xf32>
    %18 = vector.multi_reduction <maximumf>, %13, %cst_12 [1] : vector<32x128xf32> to vector<32xf32>
    %19 = vector.shape_cast %18 : vector<32xf32> to vector<32x1xf32>
    %20 = vector.broadcast %19 : vector<32x1xf32> to vector<32x128xf32>
    %21 = arith.subf %13, %20 : vector<32x128xf32>
    %22 = math.exp %21 : vector<32x128xf32>
    %cst_13 = arith.constant dense<0.000000e+00> : vector<32xf32>
    %23 = vector.multi_reduction <add>, %22, %cst_13 [1] : vector<32x128xf32> to vector<32xf32>
    %24 = vector.shape_cast %23 : vector<32xf32> to vector<32x1xf32>
    %25 = tpu.reciprocal %24 {approx = true} : vector<32x1xf32> -> vector<32x1xf32>
    %26 = vector.broadcast %25 : vector<32x1xf32> to vector<32x128xf32>
    %27 = arith.mulf %22, %26 : vector<32x128xf32>
    %c0_14 = arith.constant 0 : index
    %c0_15 = arith.constant 0 : index
    %c0_16 = arith.constant 0 : index
    %28 = vector.load %arg8[%c0_14, %c0_15, %c0_16] : memref<2x32x128xf32, #tpu.memory_space<vmem>>, vector<1x32x128xf32>
    %29 = vector.shape_cast %28 : vector<1x32x128xf32> to vector<32x128xf32>
    %30 = vector.shape_cast %27 : vector<32x128xf32> to vector<1x32x128xf32>
    tpu.vector_store %arg8[%c0_14, %c0_15, %c0_16], %30 {strides = array<i32>} : memref<2x32x128xf32, #tpu.memory_space<vmem>>, vector<1x32x128xf32>,
    %31 = arith.mulf %14, %27 : vector<32x128xf32>
    %cst_17 = arith.constant dense<0.000000e+00> : vector<32xf32>
    %32 = vector.multi_reduction <add>, %31, %cst_17 [1] : vector<32x128xf32> to vector<32xf32>
    %c0_18 = arith.constant 0 : index
    %c0_19 = arith.constant 0 : index
    %c0_20 = arith.constant 0 : index
    %33 = vector.load %arg5[%c0_18, %c0_19, %c0_20] : memref<1x2x32xf32, #tpu.memory_space<vmem>>, vector<1x1x32xf32>
    %34 = vector.shape_cast %33 : vector<1x1x32xf32> to vector<32xf32>
    %35 = vector.shape_cast %32 : vector<32xf32> to vector<1x1x32xf32>
    tpu.vector_store %arg5[%c0_18, %c0_19, %c0_20], %35 {strides = array<i32>} : memref<1x2x32xf32, #tpu.memory_space<vmem>>, vector<1x1x32xf32>,
    %cst_21 = arith.constant dense<0xFF800000> : vector<32xf32>
    %36 = vector.multi_reduction <maximumf>, %14, %cst_21 [1] : vector<32x128xf32> to vector<32xf32>
    %c0_22 = arith.constant 0 : index
    %c0_23 = arith.constant 0 : index
    %c0_24 = arith.constant 0 : index
    %37 = vector.load %arg6[%c0_22, %c0_23, %c0_24] : memref<1x2x32xf32, #tpu.memory_space<vmem>>, vector<1x1x32xf32>
    %38 = vector.shape_cast %37 : vector<1x1x32xf32> to vector<32xf32>
    %39 = vector.shape_cast %36 : vector<32xf32> to vector<1x1x32xf32>
    tpu.vector_store %arg6[%c0_22, %c0_23, %c0_24], %39 {strides = array<i32>} : memref<1x2x32xf32, #tpu.memory_space<vmem>>, vector<1x1x32xf32>,
    %40 = vector.extract_strided_slice %12 {offsets = [0, 128], sizes = [32, 128], strides = [1, 1]} : vector<32x256xf32> to vector<32x128xf32>
    %41 = vector.extract_strided_slice %7 {offsets = [0, 128], sizes = [32, 128], strides = [1, 1]} : vector<32x256xf32> to vector<32x128xf32>
    %c1 = arith.constant 1 : index
    %c0_25 = arith.constant 0 : index
    %c0_26 = arith.constant 0 : index
    %42 = vector.load %arg7[%c1, %c0_25, %c0_26] : memref<2x32x128xf32, #tpu.memory_space<vmem>>, vector<1x32x128xf32>
    %43 = vector.shape_cast %42 : vector<1x32x128xf32> to vector<32x128xf32>
    %44 = vector.shape_cast %40 : vector<32x128xf32> to vector<1x32x128xf32>
    tpu.vector_store %arg7[%c1, %c0_25, %c0_26], %44 {strides = array<i32>} : memref<2x32x128xf32, #tpu.memory_space<vmem>>, vector<1x32x128xf32>,
    %cst_27 = arith.constant dense<0xFF800000> : vector<32xf32>
    %45 = vector.multi_reduction <maximumf>, %40, %cst_27 [1] : vector<32x128xf32> to vector<32xf32>
    %46 = vector.shape_cast %45 : vector<32xf32> to vector<32x1xf32>
    %47 = vector.broadcast %46 : vector<32x1xf32> to vector<32x128xf32>
    %48 = arith.subf %40, %47 : vector<32x128xf32>
    %49 = math.exp %48 : vector<32x128xf32>
    %cst_28 = arith.constant dense<0.000000e+00> : vector<32xf32>
    %50 = vector.multi_reduction <add>, %49, %cst_28 [1] : vector<32x128xf32> to vector<32xf32>
    %51 = vector.shape_cast %50 : vector<32xf32> to vector<32x1xf32>
    %52 = tpu.reciprocal %51 {approx = true} : vector<32x1xf32> -> vector<32x1xf32>
    %53 = vector.broadcast %52 : vector<32x1xf32> to vector<32x128xf32>
    %54 = arith.mulf %49, %53 : vector<32x128xf32>
    %c1_29 = arith.constant 1 : index
    %c0_30 = arith.constant 0 : index
    %c0_31 = arith.constant 0 : index
    %55 = vector.load %arg8[%c1_29, %c0_30, %c0_31] : memref<2x32x128xf32, #tpu.memory_space<vmem>>, vector<1x32x128xf32>
    %56 = vector.shape_cast %55 : vector<1x32x128xf32> to vector<32x128xf32>
    %57 = vector.shape_cast %54 : vector<32x128xf32> to vector<1x32x128xf32>
    tpu.vector_store %arg8[%c1_29, %c0_30, %c0_31], %57 {strides = array<i32>} : memref<2x32x128xf32, #tpu.memory_space<vmem>>, vector<1x32x128xf32>,
    %58 = arith.mulf %41, %54 : vector<32x128xf32>
    %cst_32 = arith.constant dense<0.000000e+00> : vector<32xf32>
    %59 = vector.multi_reduction <add>, %58, %cst_32 [1] : vector<32x128xf32> to vector<32xf32>
    %c0_33 = arith.constant 0 : index
    %c1_34 = arith.constant 1 : index
    %c0_35 = arith.constant 0 : index
    %60 = vector.load %arg5[%c0_33, %c1_34, %c0_35] : memref<1x2x32xf32, #tpu.memory_space<vmem>>, vector<1x1x32xf32>
    %61 = vector.shape_cast %60 : vector<1x1x32xf32> to vector<32xf32>
    %62 = vector.shape_cast %59 : vector<32xf32> to vector<1x1x32xf32>
    tpu.vector_store %arg5[%c0_33, %c1_34, %c0_35], %62 {strides = array<i32>} : memref<1x2x32xf32, #tpu.memory_space<vmem>>, vector<1x1x32xf32>,
    %cst_36 = arith.constant dense<0xFF800000> : vector<32xf32>
    %63 = vector.multi_reduction <maximumf>, %41, %cst_36 [1] : vector<32x128xf32> to vector<32xf32>
    %c0_37 = arith.constant 0 : index
    %c1_38 = arith.constant 1 : index
    %c0_39 = arith.constant 0 : index
    %64 = vector.load %arg6[%c0_37, %c1_38, %c0_39] : memref<1x2x32xf32, #tpu.memory_space<vmem>>, vector<1x1x32xf32>
    %65 = vector.shape_cast %64 : vector<1x1x32xf32> to vector<32xf32>
    %66 = vector.shape_cast %63 : vector<32xf32> to vector<1x1x32xf32>
    tpu.vector_store %arg6[%c0_37, %c1_38, %c0_39], %66 {strides = array<i32>} : memref<1x2x32xf32, #tpu.memory_space<vmem>>, vector<1x1x32xf32>,
    return
  }
  func.func @transform_0(%arg0: i32) -> (i32, i32, i32) {
    %c0_i32 = arith.constant 0 : i32
    %c0_i32_0 = arith.constant 0 : i32
    %c0_i32_1 = arith.constant 0 : i32
    return %arg0, %c0_i32, %c0_i32_0 : i32, i32, i32
  }
  func.func @transform_1(%arg0: i32) -> (i32, i32, i32) {
    %c0_i32 = arith.constant 0 : i32
    %c0_i32_0 = arith.constant 0 : i32
    %c0_i32_1 = arith.constant 0 : i32
    return %arg0, %c0_i32, %c0_i32_0 : i32, i32, i32
  }
  func.func @transform_2(%arg0: i32) -> (i32, i32) {
    %c0_i32 = arith.constant 0 : i32
    %c0_i32_0 = arith.constant 0 : i32
    %c0_i32_1 = arith.constant 0 : i32
    return %c0_i32, %c0_i32_0 : i32, i32
  }
  func.func @transform_3(%arg0: i32) -> (i32, i32) {
    %c0_i32 = arith.constant 0 : i32
    %c0_i32_0 = arith.constant 0 : i32
    %c0_i32_1 = arith.constant 0 : i32
    return %c0_i32, %c0_i32_0 : i32, i32
  }
  func.func @transform_4(%arg0: i32) -> (i32, i32, i32) {
    %c0_i32 = arith.constant 0 : i32
    %c0_i32_0 = arith.constant 0 : i32
    %c0_i32_1 = arith.constant 0 : i32
    return %arg0, %c0_i32, %c0_i32_0 : i32, i32, i32
  }
  func.func @transform_5(%arg0: i32) -> (i32, i32, i32) {
    %c0_i32 = arith.constant 0 : i32
    %c0_i32_0 = arith.constant 0 : i32
    %c0_i32_1 = arith.constant 0 : i32
    return %arg0, %c0_i32, %c0_i32_0 : i32, i32, i32
  }
  func.func @transform_6(%arg0: i32) -> (i32, i32, i32) {
    %c0_i32 = arith.constant 0 : i32
    %c0_i32_0 = arith.constant 0 : i32
    %c0_i32_1 = arith.constant 0 : i32
    return %arg0, %c0_i32, %c0_i32_0 : i32, i32, i32
  }
  func.func @transform_7(%arg0: i32) -> (i32, i32, i32) {
    %c0_i32 = arith.constant 0 : i32
    %c0_i32_0 = arith.constant 0 : i32
    %c0_i32_1 = arith.constant 0 : i32
    return %arg0, %c0_i32, %c0_i32_0 : i32, i32, i32
  }
}

</mosaic_0001>

<bundles_post_ra>
// kernel: tpu_custom_call.1
= control target key start
LH: loop header
LB: loop body
LE: loop exit
PB: predicated region body
PF: predicated region fallthrough
CT: control target
= control target key end

     0   :  { %s2503_s0 = inlined_call_operand.hbm [shape: bf16[2,288,256], index: 0, kind: input, shape index: {}]   ;;  %s2504_s1 = inlined_call_operand.vmem [shape: f32[2,1,256], index: 1, kind: input, shape index: {}]   ;;  %s2505_s2 = inlined_call_operand.hbm [shape: bf16[64,288], index: 2, kind: input, shape index: {}]   ;;  %s2506_s3 = inlined_call_operand.vmem [shape: f32[64,1], index: 3, kind: input, shape index: {}]   ;;  %s2507_s4 = inlined_call_operand.hbm [shape: f32[2,2,32], index: 4, kind: output, shape index: {0}]   ;;  %s2508_s5 = inlined_call_operand.hbm [shape: f32[2,2,32], index: 5, kind: output, shape index: {1}]   ;;  %s2509_s6 = inlined_call_operand.hbm [shape: f32[4,32,128], index: 6, kind: output, shape index: {2}]   ;;  %s2510_s7 = inlined_call_operand.hbm [shape: f32[4,32,128], index: 7, kind: output, shape index: {3}]  }
   0x1   :  { %2519 = sst [smem:[#allocation18_spill]] %s2505_s2 }
   0x2   :  { %13 = vsyncpa [#allocation3], 0 }
   0x3   :  { %15 = vsyncpa [#allocation3 + $0x1], 0 }
   0x4   :  { %16 = vsyncpa [#allocation6], 0 }
   0x5   :  { %17 = vsyncpa [#allocation4], 0 }
   0x6   :  { %19 = vsyncpa [#allocation4 + $0x1], 0 }
   0x7   :  { %20 = vsyncpa [#allocation9], 0 }
   0x8   :  { %22 = vsyncpa [#allocation9 + $0x1], 0 }
   0x9   :  { %23 = vsyncpa [#allocation12], 0 }
   0xa   :  { %25 = vsyncpa [#allocation12 + $0x1], 0  ;;  %s1962_s24 = smov 0   ;;  %s1964_s25 = smov 0  }
   0xb   :  { %s1966_s26 = smov 0   ;;  %s1968_s27 = smov 0  }
   0xc LB: > { %s1983_s28 = sadd.s32 4294967295, %s1907_s27   ;;  %s2514_s29 = sadd.s32 4294967294, %s1907_s27   ;;  %s1907_s27 = sphi %s1968_s27, %s2542_s27   ;;  %s1903_s26 = sphi %s1966_s26, %s2541_s26   ;;  %s1899_s25 = sphi %s1964_s25, %s2540_s25   ;;  %s1895_s24 = sphi %s1962_s24, %s2539_s24  }
   0xd   : > { %p51_p0 = scmp.ne.s32.totalorder %s1899_s25, %s1895_s24  ;;  %p2511_p1 = scmp.eq.s32.totalorder %s1983_s28, 0 }
   0xe   : > { %p149_p3 = scmp.eq.s32.totalorder %s2514_s29, 1  ;;  %p1380_p5 = scmp.ge.s32.totalorder %s1907_s27, 1 }
   0xf   : > { %p1994_p4 = por %p2511_p1, %p51_p0  ;;  %p234_p7 = scmp.lt.s32.totalorder %s1907_s27, 3 }
  0x10   : > { %p1999_p6 = por %p149_p3, %p51_p0  ;;  %s1909_s10 = smov [#allocation5]  }
  0x11   : > { %s2520_s30 = scalar_select %p1994_p4, 1, 0 }
  0x12   : > { %s2521_s8 = scalar_select %p1999_p6, 1, 0 }
  0x13   : > { %p2004_p8 = pnand %p1380_p5, %p234_p7  ;;  %s246_s11 = sshll.u32 %s1909_s10, 4  ;;  %s2008_s11 = int_to_ptr.vmem [resolvable:$true] %s246_s11 }
  0x14   : > { %s2020_s13 = sadd.s32 1, %s1907_s27   ;;  %s38_s14 = sadd.s32 1, %s1903_s26 }
  0x15   : > { %s2522_s9 = scalar_select %p2004_p8, 1, 0 }
  0x16   : > { %p1518_p9 = pneg %p2004_p8  ;;  %s35_s15 = ssub.s32 %s1907_s27, %s2020_s13 }
  0x17   : > { %s2524_s2 = sld [smem:[#allocation18_spill]] }
  0x18   : > { %p2015_p11 = pnand %p1518_p9, %p2511_p1 }
  0x1a   : > { %p1689_p13 = pneg %p2015_p11 }
  0x1d   : > { %s1687_s18 = scalar_lea.hbm %s2524_s2, 1536 }
  0x1e   : > { %p1688_p12 = scmp.ne.s32.totalorder %s2524_s2, %s1687_s18  ;;  %p1694_p5 = scmp.lt.u32.totalorder %s1687_s18, %s2524_s2 }
  0x20   : > { %p1690_p0 = pnand %p1689_p13, %p1688_p12 }
  0x22   : > { %p1691_p3 = pneg %p1690_p0 }
  0x24   : > { %p1696_p7 = pnand %p1694_p5, %p1691_p3 }
  0x26   : > { %1699 = shalt.err (!%p1696_p7)
}
  0x27   : > { %s1700_s23 = scalar_lea.vmem %s2008_s11, 1536  ;;  %p1708_p2 = scmp.lt.s32.totalorder %s2008_s11, %s2008_s11 }
  0x28   : > { %p1701_p9 = scmp.ne.s32.totalorder %s2008_s11, %s1700_s23  ;;  %p1709_p6 = scmp.lt.s32.totalorder %s1700_s23, %s1700_s23 }
  0x2a   : > { %p1703_p10 = pnand %p1701_p9, %p1689_p13  ;;  %p1710_p4 = por %p1709_p6, %p1708_p2 }
  0x2c   : > { %p1704_p1 = pneg %p1703_p10 }
  0x2e   : > { %p1711_p8 = pnand %p1710_p4, %p1704_p1 }
  0x30   : > { %1714 = shalt.err (!%p1711_p8)
}
  0x31   : > { %s1910_s10 = smov 192   ;;  %s1911_s16 = smov 12  }
  0x32   : > { %1521 = dma.hbm_to_vmem [thread:$0]  (!%p2015_p11), %s2524_s2, 1536, %s2008_s11, [#allocation6], %s1910_s10, %s1910_s10, %s1911_s16  }
  0x33   : > { %p36_p2 = scmp.eq.s32.totalorder %s35_s15, 0  ;;  %p45_p1 = scmp.ne.s32.totalorder %s1903_s26, %s1899_s25 }
  0x34   : > { %p46_p4 = scmp.eq.s32.totalorder %s1907_s27, 0  ;;  %p1540_p6 = scmp.lt.s32.totalorder %s1907_s27, 2 }
  0x35   : > { %s2051_s19 = scalar_select %p36_p2, %s1903_s26, %s38_s14  }
  0x36   : > { %p47_p8 = por %p46_p4, %p45_p1  ;;  %p2525_p10 = scmp.eq.s32.totalorder %s1983_s28, 1 }
  0x37   : > { %s263_s21 = sand.u32 1, %s1903_s26   ;;  %s1502_s22 = smul.u32 4608, %s1907_s27 }
  0x38   : > { %p2055_p12 = por %p2525_p10, %p45_p1  ;;  %s1501_s23 = smul.u32 288, %s263_s21 }
  0x39   : > { %s2064_s17 = scalar_lea.hbm %s2503_s0, %s1502_s22  ;;  %p2066_p11 = pnand %p1540_p6, %p47_p8 }
  0x3a   : > { %s267_s14 = scalar_lea.vmem [#allocation2], %s1501_s23  ;;  %s2072_s10 = scalar_lea.sflag [#allocation3], %s263_s21 }
  0x3b   : > { %s274_s15 = sshll.u32 %s267_s14, 4  ;;  %s1715_s16 = scalar_lea.hbm %s2064_s17, 4608  ;;  %s2070_s15 = int_to_ptr.vmem [resolvable:$true] %s274_s15 }
  0x3c   : > { %p1716_p13 = scmp.ne.s32.totalorder %s2064_s17, %s1715_s16  ;;  %p1717_p0 = pneg %p2066_p11 }
  0x3d   : > { %s1720_s22 = scalar_lea.hbm %s2503_s0, 9216  ;;  %p1721_p7 = scmp.lt.u32.totalorder %s2064_s17, %s2503_s0 }
  0x3e   : > { %p1718_p3 = pnand %p1717_p0, %p1716_p13  ;;  %p1722_p9 = scmp.lt.u32.totalorder %s1720_s22, %s1715_s16 }
  0x3f   : > { %p1724_p1 = scmp.lt.u32.totalorder %s1715_s16, %s2064_s17 }
  0x40   : > { %p1719_p5 = pneg %p1718_p3  ;;  %p1723_p2 = por %p1722_p9, %p1721_p7 }
  0x42   : > { %p1725_p4 = por %p1724_p1, %p1723_p2 }
  0x44   : > { %p1726_p6 = pnand %p1725_p4, %p1719_p5 }
  0x46   : > { %1729 = shalt.err (!%p1726_p6)
}
  0x47   : > { %s1730_s21 = scalar_lea.vmem %s2070_s15, 4608  ;;  %s1912_s23 = smov [#allocation2]  }
  0x48   : > { %p1731_p8 = scmp.ne.s32.totalorder %s2070_s15, %s1730_s21  ;;  %s1735_s14 = sshll.u32 %s1912_s23, 4  ;;  %s1736_s14 = int_to_ptr.vmem [resolvable:$false] %s1735_s14 }
  0x49   : > { %s1737_s2 = scalar_lea.vmem %s1736_s14, 9216  ;;  %p1738_p3 = scmp.lt.s32.totalorder %s2070_s15, %s1736_s14 }
  0x4a   : > { %p1733_p10 = pnand %p1731_p8, %p1717_p0  ;;  %p1739_p7 = scmp.lt.s32.totalorder %s1737_s2, %s1730_s21 }
  0x4c   : > { %p1734_p13 = pneg %p1733_p10  ;;  %p1740_p9 = por %p1739_p7, %p1738_p3 }
  0x4e   : > { %p1741_p2 = pnand %p1740_p9, %p1734_p13 }
  0x50   : > { %1744 = shalt.err (!%p1741_p2)
}
  0x51   : > { %s1913_s16 = smov 128   ;;  %s1914_s29 = smov 8  }
  0x52   : > { %1525 = dma.hbm_to_vmem [thread:$0]  (!%p2066_p11), %s2064_s17, 4608, %s2070_s15, %s2072_s10, %s1913_s16, %s1913_s16, %s1914_s29  }
  0x53   : > { %p2528_p0 = scmp.ne.s32.totalorder %s2522_s9, 0 }
  0x54   : > { %s2103_s18 = sand.u32 (!%p2528_p0), 1, %s1899_s25   ;;  %p2529_p5 = scmp.ne.s32.totalorder (!%p2528_p0), %s2520_s30, 0 }
  0x55   : > { %293 = sbr.rel (%p2528_p0) target bundleno = 943 (0x3af), region = 36  ;;  %s296_s12 = scalar_lea.sflag (!%p2528_p0), [#allocation3], %s2103_s18 }
  0x56   : > { %s1503_s22 = smul.u32 (!%p2528_p0), 288, %s2103_s18 }
  0x58   : > { %s2107_s21 = scalar_lea.vmem (!%p2528_p0), [#allocation2], %s1503_s22 }
  0x5c   : > { %1874 = dma.done.wait (%p2529_p5), %s296_s12, 4608  }
  0x5d   : > { %1876 = vsyncadd (%p2529_p5), %s296_s12, 4294962688  ;;  %p2530_p11 = scmp.eq.s32.totalorder %s1983_s28, 0 }
  0x5f   : > { %1878 = dma.done.wait (%p2530_p11), [#allocation6], 1536   ;;  %p2531_p1 = pmov %p2530_p11 }
  0x60   : > { %v1915_v0 = vmov 0   ;;  %v1585_v1 = vld [vmem:[%s2107_s21 + $0x4] ss:$8 sps:$4 sm:$0xff]   ;;  %v1587_v2 = vld [vmem:[%s2107_s21] ss:$8 sps:$4 sm:$0xff]   ;;  %vm700_vm0 = vcmask 261120  }
  0x61   : > { %1880 = vsyncadd (%p2531_p1), [#allocation6], 4294965760  ;;  %818 = vmatprep.mubr.bf16.mxu0 %v1915_v0  ;;  %1583 = vset.pattern.permute.xlu0 %v1915_v0  ;;  %v1588_v3 = vld [vmem:[%s2107_s21 + $0x14] ss:$8 sps:$4 sm:$0xff]   ;;  %v1590_v4 = vld [vmem:[%s2107_s21 + $0x10] ss:$8 sps:$4 sm:$0xff]  }
  0x62   : > { %1584 = vset.pattern.permute.xlu1 %v1915_v0  ;;  %713 = vmatprep.subr.bf16.mxu1 %v1585_v1  ;;  %v1591_v5 = vld [vmem:[%s2107_s21 + $0x24] ss:$8 sps:$4 sm:$0xff]   ;;  %v1593_v6 = vld [vmem:[%s2107_s21 + $0x20] ss:$8 sps:$4 sm:$0xff]   ;;  %v1594_v7 = vld [vmem:[%s2107_s21 + $0x34] ss:$8 sps:$4 sm:$0xff]  }
  0x63   : > { %714 = vmatpush1.bf16.msra.mxu1 %v1587_v2  ;;  %v1596_v8 = vld [vmem:[%s2107_s21 + $0x30] ss:$8 sps:$4 sm:$0xff]   ;;  %v1597_v9 = vld [vmem:[%s2107_s21 + $0x44] ss:$8 sps:$4 sm:$0xff]   ;;  %v1599_v10 = vld [vmem:[%s2107_s21 + $0x40] ss:$8 sps:$4 sm:$0xff]  }
  0x64   : > { %715 = vmatprep.subr.bf16.mxu1 %v1588_v3  ;;  %v1600_v11 = vld [vmem:[%s2107_s21 + $0x54] ss:$8 sps:$4 sm:$0xff]   ;;  %v1602_v12 = vld [vmem:[%s2107_s21 + $0x50] ss:$8 sps:$4 sm:$0xff]   ;;  %v1627_v13 = vld [vmem:[%s2107_s21 + $0x104] ss:$8 sps:$4 sm:$0xff]  }
  0x65   : > { %v1603_v14 = vld [vmem:[%s2107_s21 + $0x64] ss:$8 sps:$4 sm:$0xff]   ;;  %v1631_v15 = vld [vmem:[%s2107_s21 + $0x100] ss:$8 sps:$4 sm:$0xff]   ;;  %786 = vmatprep.subr.bf16.mxu0 %v1627_v13  ;;  %v1633_v16 = vld [vmem:[%s2107_s21 + $0x114] ss:$8 sps:$4 sm:$0xff]  }
  0x66   : > { %787 = vmatpush1.bf16.msra.mxu0 %v1631_v15  ;;  %v1605_v17 = vld [vmem:[%s2107_s21 + $0x60] ss:$8 sps:$4 sm:$0xff]   ;;  %v1637_v18 = vld [vmem:[%s2107_s21 + $0x110] ss:$8 sps:$4 sm:$0xff]   ;;  %v1606_v19 = vld [vmem:[%s2107_s21 + $0x74] ss:$8 sps:$4 sm:$0xff]  }
  0x67   : > { %716 = vmatpush1.bf16.msra.mxu1 %v1590_v4  ;;  %788 = vmatprep.subr.bf16.mxu0 %v1633_v16  ;;  %v1641_v20 = vld [vmem:[#allocation5 + $0x4] ss:$12 sps:$4 sm:$0xff]   ;;  %v1642_v21 = vld [vmem:[#allocation5 + $0x8] ss:$12 sps:$4 sm:$0xff]   ;;  %v1645_v26 = vld [vmem:[#allocation5 + $0x20] ss:$12 sps:$4 sm:$0xff]  }
  0x68   : > { %717 = vmatprep.subr.bf16.mxu1 %v1591_v5  ;;  %v1608_v22 = vld [vmem:[%s2107_s21 + $0x70] ss:$8 sps:$4 sm:$0xff]   ;;  %745 = vmatprep.mubr.bf16.mxu1 %v1641_v20  ;;  %v1609_v23 = vld [vmem:[%s2107_s21 + $0x84] ss:$8 sps:$4 sm:$0xff]   ;;  %v1611_v24 = vld [vmem:[%s2107_s21 + $0x80] ss:$8 sps:$4 sm:$0xff]  }
  0x69   : > { %v1612_v25 = vld [vmem:[%s2107_s21 + $0x94] ss:$8 sps:$4 sm:$0xff]   ;;  %v416_v27 = vld [vmem:[%s2506_s3 + $0x20] sm:$0xff]  ;;  %v1614_v29 = vld [vmem:[%s2107_s21 + $0x90] ss:$8 sps:$4 sm:$0xff]   ;;  %p353_p4 = scmp.lt.s32.totalorder %s1983_s28, 1 }
  0x6a   : > { %789 = vmatpush1.bf16.msra.mxu0 %v1637_v18  ;;  %442 = vperm.xlu0 %1583, %v416_v27   ;;  %v418_v28 = vld [vmem:[%s2506_s3 + $0x30] sm:$0xff]  ;;  %v417_v30 = vld [vmem:[%s2506_s3 + $0x28] sm:$0xff]  ;;  %v419_v32 = vld [vmem:[%s2506_s3 + $0x38] sm:$0xff]  ;;  %s1466_s22 = sshll.u32 %s1983_s28, 10  ;;  %s1134_s17 = scalar_lea.sflag [#allocation12], %s2103_s18 }
  0x6b   : > { %718 = vmatpush1.bf16.msra.mxu1 %v1593_v6  ;;  %452 = vperm.xlu1 %1584, %v418_v28   ;;  %v1615_v31 = vld [vmem:[%s2107_s21 + $0xa4] ss:$8 sps:$4 sm:$0xff]   ;;  %v1617_v33 = vld [vmem:[%s2107_s21 + $0xa0] ss:$8 sps:$4 sm:$0xff]   ;;  %v1618_v34 = vld [vmem:[%s2107_s21 + $0xb4] ss:$8 sps:$4 sm:$0xff]   ;;  %s2289_s9 = scalar_lea.hbm %s2510_s7, %s1466_s22 }
  0x6c   : > { %719 = vmatprep.subr.bf16.mxu1 %v1594_v7  ;;  %v1649_v35 = vld [vmem:[#allocation5 + $0x38] ss:$12 sps:$4 sm:$0xff]   ;;  %v1623_v38 = vld [vmem:[%s2107_s21 + $0xc0] ss:$8 sps:$4 sm:$0xff]   ;;  %v1624_v39 = vld [vmem:[%s2107_s21 + $0xd4] ss:$8 sps:$4 sm:$0xff]  }
  0x6d   : > { %1439 = vmatmul.mubr.msk.bf16.vlgmr.msra.gmra.mrb[0].mxu0 %vm700_vm0, %v1642_v21  ;;  %v1620_v36 = vld [vmem:[%s2107_s21 + $0xb0] ss:$8 sps:$4 sm:$0xff]   ;;  %v1621_v37 = vld [vmem:[%s2107_s21 + $0xc4] ss:$8 sps:$4 sm:$0xff]   ;;  %v1632_v43 = vld [vmem:[%s2107_s21 + $0xe0] ss:$8 sps:$4 sm:$0xff]  }
  0x6e   : > { %828 = vmatprep.mubr.bf16.mxu0 %v1915_v0  ;;  %447 = vperm.xlu0 %1583, %v417_v30   ;;  %v1654_v40 = vld [vmem:[#allocation5 + $0x50] ss:$12 sps:$4 sm:$0xff]   ;;  %v1629_v42 = vld [vmem:[%s2107_s21 + $0xe4] ss:$8 sps:$4 sm:$0xff]   ;;  %v1647_v49 = vld [vmem:[#allocation5 + $0x34] ss:$12 sps:$4 sm:$0xff]  }
  0x6f   : > { %720 = vmatpush1.bf16.msra.mxu1 %v1596_v8  ;;  %457 = vperm.xlu1 %1584, %v419_v32   ;;  %v1626_v41 = vld [vmem:[%s2107_s21 + $0xd0] ss:$8 sps:$4 sm:$0xff]   ;;  %v1635_v44 = vld [vmem:[%s2107_s21 + $0xf4] ss:$8 sps:$4 sm:$0xff]   ;;  %v1639_v46 = vld [vmem:[#allocation5] ss:$12 sps:$4 sm:$0xff]  }
  0x70   : > { %721 = vmatprep.subr.bf16.mxu1 %v1597_v9  ;;  %v1638_v45 = vld [vmem:[%s2107_s21 + $0xf0] ss:$8 sps:$4 sm:$0xff]   ;;  %v1643_v47 = vld [vmem:[#allocation5 + $0x1c] ss:$12 sps:$4 sm:$0xff]   ;;  %s354_s2 = scalar_select %p353_p4, %s1983_s28, 1  ;;  %v861_v9 = vlaneseq }
  0x71   : > { %v1646_v48 = vld [vmem:[#allocation5 + $0x18] ss:$12 sps:$4 sm:$0xff]   ;;  %v1650_v50 = vld [vmem:[#allocation5 + $0x30] ss:$12 sps:$4 sm:$0xff]   ;;  %v1653_v52 = vld [vmem:[#allocation5 + $0x48] ss:$12 sps:$4 sm:$0xff]  }
  0x72   : > { %v1651_v51 = vld [vmem:[#allocation5 + $0x4c] ss:$12 sps:$4 sm:$0xff]   ;;  %s1390_s16 = sshll.u32 %s354_s2, 1  ;;  %s1388_s21 = sshll.u32 %s2103_s18, 6 }
  0x73   : > { %722 = vmatpush1.bf16.msra.mxu1 %v1599_v10  ;;  %s356_s12 = scalar_lea.vmem %s2504_s1, %s1390_s16  ;;  %s2220_s30 = scalar_lea.vmem [#allocation10], %s1388_s21 }
  0x74   : > { %723 = vmatprep.subr.bf16.mxu1 %v1600_v11  ;;  %s2257_s16 = scalar_lea.vmem [#allocation11], %s1388_s21  ;;  %s1916_s15 = smov [#allocation11]  }
  0x75   : > { %1440 = vmatmul.mubr.msk.bf16.gmra.mrb[4].mxu0 %vm700_vm0, %v1645_v26  ;;  %s1191_s29 = sshll.u32 %s2257_s16, 4  ;;  %s1749_s10 = sshll.u32 %s1916_s15, 4  ;;  %s2291_s29 = int_to_ptr.vmem [resolvable:$true] %s1191_s29  ;;  %s1750_s10 = int_to_ptr.vmem [resolvable:$false] %s1749_s10 }
  0x76   : > { %838 = vmatprep.mubr.bf16.mxu0 %v1915_v0  ;;  %s1745_s11 = scalar_lea.vmem %s2291_s29, 1024  ;;  %s1751_s23 = scalar_lea.vmem %s1750_s10, 2048 }
  0x77   : > { %724 = vmatpush1.bf16.msra.mxu1 %v1602_v12  ;;  %v2206_v12 = vshrl.u32 %v861_v9, 7  ;;  %p1746_p6 = scmp.ne.s32.totalorder %s2291_s29, %s1745_s11  ;;  %p1752_p13 = scmp.lt.s32.totalorder %s2291_s29, %s1750_s10 }
  0x78   : > { %725 = vmatprep.subr.bf16.mxu1 %v1603_v14  ;;  %p1753_p3 = scmp.lt.s32.totalorder %s1751_s23, %s1745_s11 }
  0x79   : > { %v863_v16 = vsub.s32 0, %v2206_v12  ;;  %v867_v18 = vsub.s32 1, %v2206_v12  ;;  %p1747_p8 = pnand %p1746_p6, %p2055_p12 }
  0x7a   : > { %p1754_p7 = por %p1753_p3, %p1752_p13 }
  0x7b   : > { %726 = vmatpush1.bf16.msra.mxu1 %v1605_v17  ;;  %v859_v17 = vld [vmem:[%s356_s12] sm:$0x3]  ;;  %p1748_p10 = pneg %p1747_p8 }
  0x7c   : > { %727 = vmatprep.subr.bf16.mxu1 %v1606_v19  ;;  %v868_v27 = vrot.slane %v859_v17, %v867_v18 }
  0x7d   : > { %1441 = vmatmul.mubr.msk.bf16.gmra.mrb[8].mxu0 %vm700_vm0, %v1649_v35  ;;  %p1755_p9 = pnand %p1754_p7, %p1748_p10 }
  0x7e   : > { %848 = vmatprep.mubr.bf16.mxu0 %v1915_v0 }
  0x7f   : > { %728 = vmatpush1.bf16.msra.mxu1 %v1608_v22 }
  0x80   : > { %729 = vmatprep.subr.bf16.mxu1 %v1609_v23  ;;  %v864_v23 = vrot.slane %v859_v17, %v863_v16 }
  0x83   : > { %730 = vmatpush1.bf16.msra.mxu1 %v1611_v24 }
  0x84   : > { %731 = vmatprep.subr.bf16.mxu1 %v1612_v25 }
  0x85   : > { %1442 = vmatmul.mubr.msk.bf16.gmra.mrb[12].mxu0 %vm700_vm0, %v1654_v40 }
  0x87   : > { %732 = vmatpush1.bf16.msra.mxu1 %v1614_v29 }
  0x88   : > { %733 = vmatprep.subr.bf16.mxu1 %v1615_v31 }
  0x8b   : > { %734 = vmatpush1.bf16.msra.mxu1 %v1617_v33 }
  0x8c   : > { %735 = vmatprep.subr.bf16.mxu1 %v1618_v34 }
  0x8f   : > { %736 = vmatpush1.bf16.msra.mxu1 %v1620_v36 }
  0x90   : > { %737 = vmatprep.subr.bf16.mxu1 %v1621_v37 }
  0x93   : > { %738 = vmatpush1.bf16.msra.mxu1 %v1623_v38 }
  0x94   : > { %739 = vmatprep.subr.bf16.mxu1 %v1624_v39 }
  0x97   : > { %740 = vmatpush1.bf16.msra.mxu1 %v1626_v41 }
  0x98   : > { %741 = vmatprep.subr.bf16.mxu1 %v1629_v42 }
  0x9b   : > { %742 = vmatpush1.bf16.msra.mxu1 %v1632_v43 }
  0x9c   : > { %743 = vmatprep.subr.bf16.mxu1 %v1635_v44 }
  0x9f   : > { %744 = vmatpush1.bf16.msra.mxu1 %v1638_v45 }
  0xa2   : > { %746 = vmatmul.mubr.bf16.vlgmr.msra.gmra.mrb[0].mxu1 %v1639_v46 }
  0xa3   : > { %755 = vmatprep.mubr.bf16.mxu1 %v1643_v47 }
  0xaa   : > { %756 = vmatmul.mubr.bf16.gmra.mrb[4].mxu1 %v1646_v48 }
  0xab   : > { %765 = vmatprep.mubr.bf16.mxu1 %v1647_v49 }
  0xb2   : > { %766 = vmatmul.mubr.bf16.gmra.mrb[8].mxu1 %v1650_v50 }
  0xb3   : > { %775 = vmatprep.mubr.bf16.mxu1 %v1651_v51 }
  0xba   : > { %776 = vmatmul.mubr.bf16.gmra.mrb[12].mxu1 %v1653_v52 }
  0xe9   : > { %v443_v15 = vpop.permute.xlu0 %442 }
  0xea   : > { %v453_v26 = vpop.permute.xlu1 %452 }
  0xed   : > { %v448_v20 = vpop.permute.xlu0 %447 }
  0xee   : > { %v458_v39 = vpop.permute.xlu1 %457 }
 0x140   : > { %v2175_v53 = vpop.f32.mrb[0].mxu0 }
 0x141   : > { %v2177_v54 = vpop.f32.mrb[1].mxu0 }
 0x142   : > { %v2179_v55 = vpop.f32.mrb[2].mxu0 }
 0x143   : > { %v2181_v56 = vpop.f32.mrb[3].mxu0 }
 0x148   : > { %v2183_v57 = vpop.f32.mrb[4].mxu0 }
 0x149   : > { %v2185_v58 = vpop.f32.mrb[5].mxu0 }
 0x14a   : > { %v2187_v59 = vpop.f32.mrb[6].mxu0 }
 0x14b   : > { %v2189_v60 = vpop.f32.mrb[7].mxu0 }
 0x150   : > { %v840_v61 = vpop.f32.mrb[8].mxu0 }
 0x151   : > { %v842_v62 = vpop.f32.mrb[9].mxu0 }
 0x152   : > { %v844_v63 = vpop.f32.mrb[10].mxu0 }
 0x153   : > { %v846_v0 = vpop.f32.mrb[11].mxu0 }
 0x158   : > { %v850_v1 = vpop.f32.mrb[12].mxu0 }
 0x159   : > { %v852_v2 = vpop.f32.mrb[13].mxu0 }
 0x15a   : > { %v854_v3 = vpop.f32.mrb[14].mxu0 }
 0x15b   : > { %v856_v4 = vpop.f32.mrb[15].mxu0 }
 0x175   : > { %v2191_v5 = vpop.f32.mrb[0].mxu1 }
 0x176   : > { %v2194_v6 = vpop.f32.mrb[1].mxu1 }
 0x177   : > { %v2196_v7 = vpop.f32.mrb[2].mxu1 }
 0x178   : > { %v2198_v8 = vpop.f32.mrb[3].mxu1 }
 0x17d   : > { %v2201_v10 = vpop.f32.mrb[4].mxu1 }
 0x17e   : > { %v2203_v11 = vpop.f32.mrb[5].mxu1 }
 0x17f   : > { %v2208_v13 = vpop.f32.mrb[6].mxu1 }
 0x180   : > { %v2210_v14 = vpop.f32.mrb[7].mxu1 }
 0x185   : > { %v767_v19 = vpop.f32.mrb[8].mxu1 }
 0x186   : > { %v768_v21 = vadd.f32 %v767_v19, %v443_v15  ;;  %v769_v22 = vpop.f32.mrb[9].mxu1 }
 0x187   : > { %v770_v24 = vadd.f32 %v769_v22, %v443_v15  ;;  %v771_v25 = vpop.f32.mrb[10].mxu1 }
 0x188   : > { %v841_v28 = vadd.f32 %v840_v61, %v768_v21  ;;  %v772_v29 = vadd.f32 %v771_v25, %v448_v20  ;;  %v773_v30 = vpop.f32.mrb[11].mxu1 }
 0x189   : > { %v843_v31 = vadd.f32 %v842_v62, %v770_v24  ;;  %v774_v32 = vadd.f32 %v773_v30, %v448_v20 }
 0x18a   : > { %v845_v33 = vadd.f32 %v844_v63, %v772_v29  ;;  %v871_v34 = vadd.f32 %v864_v23, %v841_v28 }
 0x18b   : > { %v847_v35 = vadd.f32 %v846_v0, %v774_v32  ;;  %v872_v36 = vadd.f32 %v868_v27, %v843_v31  ;;  %v412_v0 = vld [vmem:[%s2506_s3] sm:$0xff] }
 0x18c   : > { %883 = vmax.xlane.f32.xlu0 %v871_v34  ;;  %879 = vst [vmem:[%s2220_s30] sm:$0xff] %v871_v34  ;;  %v873_v37 = vadd.f32 %v864_v23, %v845_v33 }
 0x18d   : > { %v777_v38 = vpop.f32.mrb[12].mxu1  ;;  %1443 = vst [vmem:[%s2220_s30 + $0x20] sm:$0xff] %v872_v36  ;;  %v874_v40 = vadd.f32 %v868_v27, %v847_v35 }
 0x18e   : > { %v778_v41 = vadd.f32 %v777_v38, %v453_v26  ;;  %v779_v42 = vpop.f32.mrb[13].mxu1  ;;  %885 = vmax.xlane.f32.xlu1 %v873_v37  ;;  %880 = vst [vmem:[%s2220_s30 + $0x8] sm:$0xff] %v873_v37 }
 0x18f   : > { %v780_v43 = vadd.f32 %v779_v42, %v453_v26  ;;  %v781_v44 = vpop.f32.mrb[14].mxu1  ;;  %1444 = vst [vmem:[%s2220_s30 + $0x28] sm:$0xff] %v874_v40 }
 0x190   : > { %v851_v45 = vadd.f32 %v850_v1, %v778_v41  ;;  %v782_v46 = vadd.f32 %v781_v44, %v458_v39  ;;  %v783_v47 = vpop.f32.mrb[15].mxu1  ;;  %1007 = vmax.xlane.f32.xlu0 %v872_v36 }
 0x191   : > { %v784_v48 = vadd.f32 %v783_v47, %v458_v39  ;;  %v853_v49 = vadd.f32 %v852_v2, %v780_v43 }
 0x192   : > { %v875_v50 = vadd.f32 %v864_v23, %v851_v45  ;;  %v855_v51 = vadd.f32 %v854_v3, %v782_v46  ;;  %v413_v46 = vld [vmem:[%s2506_s3 + $0x8] sm:$0xff] }
 0x193   : > { %v876_v52 = vadd.f32 %v868_v27, %v853_v49  ;;  %v857_v61 = vadd.f32 %v856_v4, %v784_v48 }
 0x194   : > { %881 = vst [vmem:[%s2220_s30 + $0x10] sm:$0xff] %v875_v50  ;;  %v877_v62 = vadd.f32 %v864_v23, %v855_v51  ;;  %887 = vmax.xlane.f32.xlu1 %v875_v50  ;;  %1009 = vmax.xlane.f32.xlu0 %v874_v40 }
 0x195   : > { %1445 = vst [vmem:[%s2220_s30 + $0x30] sm:$0xff] %v876_v52  ;;  %v878_v63 = vadd.f32 %v868_v27, %v857_v61 }
 0x196   : > { %882 = vst [vmem:[%s2220_s30 + $0x18] sm:$0xff] %v877_v62 }
 0x197   : > { %1446 = vst [vmem:[%s2220_s30 + $0x38] sm:$0xff] %v878_v63 }
 0x198   : > { %889 = vmax.xlane.f32.xlu1 %v877_v62  ;;  %1011 = vmax.xlane.f32.xlu0 %v876_v52 }
 0x19c   : > { %1013 = vmax.xlane.f32.xlu0 %v878_v63 }
 0x1a9   : > { %422 = vperm.xlu1 %1584, %v412_v0  }
 0x219   : > { %v884_v1 = vpop.xlane.xlu0 %883 }
 0x21a   : > { %v891_v2 = vsub.f32 %v871_v34, %v884_v1 }
 0x21b   : > { %v886_v3 = vpop.xlane.xlu1 %885 }
 0x21c   : > { %v895_v4 = vmul.f32 1.442695, %v891_v2  ;;  %v892_v15 = vsub.f32 %v873_v37, %v886_v3 }
 0x21d   : > { %v1008_v16 = vpop.xlane.xlu0 %1007 }
 0x21e   : > { %1655 = vpow2.f32 %v895_v4  ;;  %v897_v17 = vmul.f32 1.442695, %v892_v15  ;;  %v1015_v18 = vsub.f32 %v872_v36, %v1008_v16 }
 0x220   : > { %1657 = vpow2.f32 %v897_v17  ;;  %v1019_v19 = vmul.f32 1.442695, %v1015_v18 }
 0x221   : > { %v888_v20 = vpop.xlane.xlu1 %887  ;;  %v1010_v21 = vpop.xlane.xlu0 %1009 }
 0x222   : > { %1659 = vpow2.f32 %v1019_v19  ;;  %v893_v22 = vsub.f32 %v875_v50, %v888_v20  ;;  %v1016_v23 = vsub.f32 %v874_v40, %v1010_v21 }
 0x224   : > { %v899_v24 = vmul.f32 1.442695, %v893_v22  ;;  %v1021_v25 = vmul.f32 1.442695, %v1016_v23 }
 0x225   : > { %v890_v26 = vpop.xlane.xlu1 %889  ;;  %v1012_v27 = vpop.xlane.xlu0 %1011 }
 0x226   : > { %1661 = vpow2.f32 %v899_v24  ;;  %v894_v28 = vsub.f32 %v877_v62, %v890_v26  ;;  %v1017_v29 = vsub.f32 %v876_v52, %v1012_v27 }
 0x227   : > { %1663 = vpow2.f32 %v1021_v25 }
 0x228   : > { %v1656_v30 = vpop.eup %1655  ;;  %v901_v31 = vmul.f32 1.442695, %v894_v28  ;;  %v1023_v32 = vmul.f32 1.442695, %v1017_v29 }
 0x229   : > { %v423_v33 = vpop.permute.xlu1 %422  ;;  %903 = vadd.xlane.f32.xlu1 %v1656_v30  ;;  %v1014_v34 = vpop.xlane.xlu0 %1013 }
 0x22a   : > { %v1658_v35 = vpop.eup %1657  ;;  %1665 = vpow2.f32 %v901_v31  ;;  %v748_v36 = vadd.f32 %v2191_v5, %v423_v33  ;;  %v750_v37 = vadd.f32 %v2194_v6, %v423_v33  ;;  %v1018_v38 = vsub.f32 %v878_v63, %v1014_v34 }
 0x22b   : > { %1667 = vpow2.f32 %v1023_v32  ;;  %905 = vadd.xlane.f32.xlu0 %v1658_v35 }
 0x22c   : > { %v1660_v39 = vpop.eup %1659  ;;  %v1025_v40 = vmul.f32 1.442695, %v1018_v38  ;;  %v2236_v41 = vadd.f32 %v2175_v53, %v748_v36  ;;  %v2239_v42 = vadd.f32 %v2177_v54, %v750_v37  ;;  %v414_v53 = vld [vmem:[%s2506_s3 + $0x10] sm:$0xff]  ;;  %v415_v54 = vld [vmem:[%s2506_s3 + $0x18] sm:$0xff] }
 0x22d   : > { %1027 = vadd.xlane.f32.xlu1 %v1660_v39 }
 0x22e   : > { %1669 = vpow2.f32 %v1025_v40 }
 0x230   : > { %v1662_v43 = vpop.eup %1661 }
 0x231   : > { %v1664_v44 = vpop.eup %1663  ;;  %907 = vadd.xlane.f32.xlu1 %v1662_v43 }
 0x232   : > { %1029 = vadd.xlane.f32.xlu0 %v1664_v44 }
 0x234   : > { %v1666_v5 = vpop.eup %1665 }
 0x235   : > { %v1668_v45 = vpop.eup %1667  ;;  %909 = vadd.xlane.f32.xlu1 %v1666_v5 }
 0x236   : > { %1031 = vadd.xlane.f32.xlu0 %v1668_v45 }
 0x238   : > { %v2241_v6 = vpop.eup %1669 }
 0x23a   : > { %1033 = vadd.xlane.f32.xlu0 %v2241_v6 }
 0x246   : > { %432 = vperm.xlu1 %1584, %v414_v53  }
 0x24a   : > { %437 = vperm.xlu1 %1584, %v415_v54  }
 0x250   : > { %427 = vperm.xlu0 %1583, %v413_v46  }
 0x26f   : > { %969 = vmax.xlane.f32.xlu0 %v2236_v41 }
 0x273   : > { %1085 = vmax.xlane.f32.xlu0 %v2239_v42 }
 0x2b6   : > { %v904_v47 = vpop.xlane.xlu1 %903 }
 0x2b7   : > { %1671 = vrcp.f32 %v904_v47 }
 0x2b8   : > { %v906_v48 = vpop.xlane.xlu0 %905 }
 0x2b9   : > { %1673 = vrcp.f32 %v906_v48 }
 0x2ba   : > { %v1028_v49 = vpop.xlane.xlu1 %1027 }
 0x2bb   : > { %1675 = vrcp.f32 %v1028_v49 }
 0x2be   : > { %v908_v50 = vpop.xlane.xlu1 %907 }
 0x2bf   : > { %1677 = vrcp.f32 %v908_v50  ;;  %v1030_v51 = vpop.xlane.xlu0 %1029 }
 0x2c0   : > { %1679 = vrcp.f32 %v1030_v51 }
 0x2c1   : > { %v1672_v52 = vpop.eup %1671 }
 0x2c2   : > { %v910_v61 = vpop.xlane.xlu1 %909  ;;  %v915_v62 = vmul.f32 %v1672_v52, %v1656_v30 }
 0x2c3   : > { %v1674_v63 = vpop.eup %1673  ;;  %1681 = vrcp.f32 %v910_v61  ;;  %v1032_v0 = vpop.xlane.xlu0 %1031 }
 0x2c4   : > { %1683 = vrcp.f32 %v1032_v0  ;;  %919 = vst [vmem:[%s2257_s16] sm:$0xff] %v915_v62  ;;  %v916_v1 = vmul.f32 %v1674_v63, %v1658_v35 }
 0x2c5   : > { %v1676_v2 = vpop.eup %1675 }
 0x2c6   : > { %v433_v3 = vpop.permute.xlu1 %432  ;;  %v1039_v4 = vmul.f32 %v1676_v2, %v1660_v39  ;;  %920 = vst [vmem:[%s2257_s16 + $0x8] sm:$0xff] %v916_v1 }
 0x2c7   : > { %v758_v15 = vadd.f32 %v2201_v10, %v433_v3  ;;  %v760_v16 = vadd.f32 %v2203_v11, %v433_v3  ;;  %v1034_v17 = vpop.xlane.xlu0 %1033 }
 0x2c8   : > { %1685 = vrcp.f32 %v1034_v17  ;;  %1447 = vst [vmem:[%s2257_s16 + $0x20] sm:$0xff] %v1039_v4 }
 0x2c9   : > { %v1678_v18 = vpop.eup %1677  ;;  %v833_v19 = vadd.f32 %v2185_v58, %v760_v16  ;;  %v831_v20 = vadd.f32 %v2183_v57, %v758_v15 }
 0x2ca   : > { %v1680_v21 = vpop.eup %1679  ;;  %v438_v22 = vpop.permute.xlu1 %437  ;;  %v917_v23 = vmul.f32 %v1678_v18, %v1662_v43 }
 0x2cb   : > { %v762_v24 = vadd.f32 %v2208_v13, %v438_v22  ;;  %v764_v10 = vadd.f32 %v2210_v14, %v438_v22  ;;  %v1040_v25 = vmul.f32 %v1680_v21, %v1664_v44 }
 0x2cc   : > { %921 = vst [vmem:[%s2257_s16 + $0x10] sm:$0xff] %v917_v23 }
 0x2cd   : > { %v1682_v11 = vpop.eup %1681  ;;  %v835_v26 = vadd.f32 %v2187_v59, %v762_v24  ;;  %v837_v27 = vadd.f32 %v2189_v60, %v764_v10  ;;  %1448 = vst [vmem:[%s2257_s16 + $0x28] sm:$0xff] %v1040_v25  ;;  %v923_v60 = vmul.f32 %v915_v62, %v2236_v41 }
 0x2ce   : > { %v1684_v58 = vpop.eup %1683  ;;  %v918_v57 = vmul.f32 %v1682_v11, %v1666_v5 }
 0x2cf   : > { %v428_v28 = vpop.permute.xlu0 %427  ;;  %v1041_v29 = vmul.f32 %v1684_v58, %v1668_v45 }
 0x2d0   : > { %v752_v30 = vadd.f32 %v2196_v7, %v428_v28  ;;  %v754_v31 = vadd.f32 %v2198_v8, %v428_v28  ;;  %922 = vst [vmem:[%s2257_s16 + $0x18] sm:$0xff] %v918_v57  ;;  %v926_v34 = vmul.f32 %v918_v57, %v835_v26 }
 0x2d1   : > { %1449 = vst [vmem:[%s2257_s16 + $0x30] sm:$0xff] %v1041_v29  ;;  %v1050_v8 = vmul.f32 %v1041_v29, %v833_v19 }
 0x2d2   : > { %v1686_v13 = vpop.eup %1685  ;;  %v827_v14 = vadd.f32 %v2181_v56, %v754_v31  ;;  %v825_v32 = vadd.f32 %v2179_v55, %v752_v30  ;;  %v1048_v56 = vmul.f32 %v1039_v4, %v2239_v42  ;;  %v925_v55 = vmul.f32 %v917_v23, %v831_v20 }
 0x2d3   : > { %v1042_v59 = vmul.f32 %v1686_v13, %v2241_v6 }
 0x2d4   : > { %1087 = vmax.xlane.f32.xlu0 %v827_v14  ;;  %971 = vmax.xlane.f32.xlu1 %v825_v32  ;;  %v1049_v7 = vmul.f32 %v1040_v25, %v827_v14  ;;  %v924_v33 = vmul.f32 %v916_v1, %v825_v32 }
 0x2d5   : > { %1450 = vst [vmem:[%s2257_s16 + $0x38] sm:$0xff] %v1042_v59  ;;  %v1051_v35 = vmul.f32 %v1042_v59, %v837_v27 }
 0x2d8   : > { %1089 = vmax.xlane.f32.xlu0 %v833_v19  ;;  %973 = vmax.xlane.f32.xlu1 %v831_v20 }
 0x2dc   : > { %975 = vmax.xlane.f32.xlu0 %v835_v26  ;;  %927 = vadd.xlane.f32.xlu1 %v923_v60 }
 0x2e0   : > { %1091 = vmax.xlane.f32.xlu0 %v837_v27  ;;  %1054 = vadd.xlane.f32.xlu1 %v1049_v7 }
 0x2e4   : > { %1052 = vadd.xlane.f32.xlu0 %v1048_v56  ;;  %931 = vadd.xlane.f32.xlu1 %v925_v55 }
 0x2e8   : > { %1056 = vadd.xlane.f32.xlu1 %v1050_v8  ;;  %929 = vadd.xlane.f32.xlu0 %v924_v33 }
 0x2ec   : > { %933 = vadd.xlane.f32.xlu1 %v926_v34  ;;  %1058 = vadd.xlane.f32.xlu0 %v1051_v35 }
 0x2ed   : > { %1758 = shalt.err (!%p1755_p9)
}
 0x2ee   : > { %s1759_s14 = scalar_lea.hbm %s2289_s9, 1024  ;;  %s1763_s12 = scalar_lea.hbm %s2510_s7, 2048 }
 0x2ef   : > { %p1760_p2 = scmp.ne.s32.totalorder %s2289_s9, %s1759_s14  ;;  %p1764_p11 = scmp.lt.u32.totalorder %s2289_s9, %s2510_s7 }
 0x2f0   : > { %p1765_p1 = scmp.lt.u32.totalorder %s1763_s12, %s1759_s14  ;;  %p1767_p6 = scmp.lt.u32.totalorder %s1759_s14, %s2289_s9 }
 0x2f1   : > { %p1761_p0 = pnand %p1760_p2, %p2055_p12 }
 0x2f2   : > { %p1766_p4 = por %p1765_p1, %p1764_p11 }
 0x2f3   : > { %p1762_p5 = pneg %p1761_p0 }
 0x2f4   : > { %p1768_p8 = por %p1767_p6, %p1766_p4 }
 0x2f6   : > { %p1769_p10 = pnand %p1768_p8, %p1762_p5 }
 0x2f8   : > { %1772 = shalt.err (!%p1769_p10)
}
 0x2f9   : > { %s2517_s11 = smov 128   ;;  %s2518_s10 = smov 8   ;;  %v940_v37 = vand.u32 127, %v861_v9  ;;  %vm950_vm1 = vcmask 130112   ;;  %vm957_vm2 = vcmask 195712   ;;  %vm964_vm3 = vcmask 261312  }
 0x2fa   : > { %1513 = dma.vmem_to_hbm [thread:$0]  (%p2055_p12), %s2291_s29, 1024, %s2289_s9, %s1134_s17, %s2517_s11, %s2517_s11, %s2518_s10   ;;  %vm967_vm4 = vcmask 253952  }
 0x2fb   : > { %v945_v39 = vadd.s32 4294967288, %v940_v37  ;;  %v952_v40 = vadd.s32 4294967280, %v940_v37  ;;  %v959_v44 = vadd.s32 4294967272, %v940_v37  ;;  %v2328_v45 = vsub.s32 %v940_v37, %v2206_v12  ;;  %s2515_s29 = sshll.u32 %s2103_s18, 1  ;;  %s1123_s9 = sand.u32 1, %s1983_s28  }
 0x2fc   : > { %v970_v36 = vpop.xlane.xlu0 %969  ;;  %s2516_s17 = sshll.u32 %s1983_s28, 5  ;;  %s338_s23 = scalar_lea.vmem [#allocation8], %s2515_s29 }
 0x2fd   : > { %v2322_v43 = vsub.s32 %v945_v39, %v2206_v12  ;;  %v2325_v5 = vsub.s32 %v952_v40, %v2206_v12  ;;  %v2332_v54 = vsub.s32 %v959_v44, %v2206_v12  ;;  %v984_v47 = vrot.slane %v970_v36, %v2328_v45  ;;  %s1160_s14 = sshll.u32 %s338_s23, 4  ;;  %s1174_s2 = sshll.u32 %s2220_s30, 4  ;;  %s2364_s14 = int_to_ptr.vmem [resolvable:$true] %s1160_s14  ;;  %s2366_s2 = int_to_ptr.vmem [resolvable:$true] %s1174_s2 }
 0x2fe   : > { %s2362_s21 = scalar_lea.hbm %s2508_s5, %s2516_s17  ;;  %s2374_s29 = scalar_lea.hbm %s2509_s6, %s1466_s22 }
 0x2ff   : > { %s2381_s16 = scalar_lea.sflag [#allocation9], %s1123_s9  ;;  %s1773_s12 = scalar_lea.vmem %s2364_s14, 32 }
 0x300   : > { %v1086_v38 = vpop.xlane.xlu0 %1085  ;;  %p1774_p13 = scmp.ne.s32.totalorder %s2364_s14, %s1773_s12  ;;  %s1919_s17 = smov [#allocation8]  }
 0x301   : > { %v1100_v62 = vrot.slane %v1086_v38, %v2328_v45  ;;  %s1777_s11 = sshll.u32 %s1919_s17, 4  ;;  %s1778_s11 = int_to_ptr.vmem [resolvable:$false] %s1777_s11 }
 0x302   : > { %p1775_p3 = pnand %p1774_p13, %p2055_p12  ;;  %s1779_s10 = scalar_lea.vmem %s1778_s11, 64 }
 0x303   : > { %p1780_p9 = scmp.lt.s32.totalorder %s2364_s14, %s1778_s11  ;;  %p1781_p2 = scmp.lt.s32.totalorder %s1779_s10, %s1773_s12 }
 0x304   : > { %p1776_p7 = pneg %p1775_p3 }
 0x305   : > { %p1782_p0 = por %p1781_p2, %p1780_p9 }
 0x307   : > { %p1783_p5 = pnand %p1782_p0, %p1776_p7 }
 0x361   : > { %v972_v41 = vpop.xlane.xlu1 %971  ;;  %v1088_v42 = vpop.xlane.xlu0 %1087 }
 0x362   : > { %v988_v9 = vrot.slane %v972_v41, %v2322_v43  ;;  %v1104_v51 = vrot.slane %v1088_v42, %v2322_v43 }
 0x364   : > { %v989_v50 = vsel %vm950_vm1, %v988_v9, %v984_v47  ;;  %v1105_v2 = vsel %vm950_vm1, %v1104_v51, %v1100_v62 }
 0x365   : > { %v974_v6 = vpop.xlane.xlu1 %973  ;;  %v1090_v53 = vpop.xlane.xlu0 %1089 }
 0x366   : > { %v993_v46 = vrot.slane %v974_v6, %v2325_v5  ;;  %v1109_v61 = vrot.slane %v1090_v53, %v2325_v5 }
 0x368   : > { %v994_v52 = vsel %vm957_vm2, %v993_v46, %v989_v50  ;;  %v1110_v4 = vsel %vm957_vm2, %v1109_v61, %v1105_v2 }
 0x369   : > { %v2337_v48 = vpop.xlane.xlu1 %927  ;;  %v976_v49 = vpop.xlane.xlu0 %975 }
 0x36a   : > { %v998_v12 = vrot.slane %v976_v49, %v2332_v54 }
 0x36c   : > { %v999_v63 = vsel %vm964_vm3, %v998_v12, %v994_v52 }
 0x36d   : > { %v2351_v0 = vpop.xlane.xlu1 %1054  ;;  %v1092_v1 = vpop.xlane.xlu0 %1091  ;;  %1001 = vst.msk [vmem:[%s338_s23] sm:$0x1] %vm967_vm4, %v999_v63 }
 0x36e   : > { %v1114_v3 = vrot.slane %v1092_v1, %v2332_v54 }
 0x370   : > { %v1115_v15 = vsel %vm964_vm3, %v1114_v3, %v1110_v4 }
 0x371   : > { %v2376_v16 = vpop.xlane.xlu1 %931  ;;  %v2378_v17 = vpop.xlane.xlu0 %1052  ;;  %1117 = vst.msk [vmem:[%s338_s23 + $0x1] sm:$0x1] %vm967_vm4, %v1115_v15 }
 0x372   : > { %1786 = shalt.err (!%p1783_p5)
}
 0x373   : > { %s1787_s22 = scalar_lea.hbm %s2362_s21, 32  ;;  %s1791_s17 = scalar_lea.hbm %s2508_s5, 64 }
 0x374   : > { %p1788_p11 = scmp.ne.s32.totalorder %s2362_s21, %s1787_s22  ;;  %p1792_p6 = scmp.lt.u32.totalorder %s2362_s21, %s2508_s5 }
 0x375   : > { %p1793_p8 = scmp.lt.u32.totalorder %s1791_s17, %s1787_s22  ;;  %p1795_p13 = scmp.lt.u32.totalorder %s1787_s22, %s2362_s21 }
 0x376   : > { %p1789_p1 = pnand %p1788_p11, %p2055_p12 }
 0x377   : > { %p1794_p10 = por %p1793_p8, %p1792_p6 }
 0x378   : > { %p1790_p4 = pneg %p1789_p1 }
 0x379   : > { %p1796_p3 = por %p1795_p13, %p1794_p10 }
 0x37b   : > { %p1797_p7 = pnand %p1796_p3, %p1790_p4 }
 0x37d   : > { %1800 = shalt.err (!%p1797_p7)
}
 0x37e   : > { %1511 = dma.vmem_to_hbm [thread:$0]  (%p2055_p12), %s2364_s14, 32, %s2362_s21, %s2381_s16  }
 0x37f   : > { %s1801_s10 = scalar_lea.vmem %s2366_s2, 1024  ;;  %s1920_s15 = smov [#allocation10]  }
 0x380   : > { %p1802_p9 = scmp.ne.s32.totalorder %s2366_s2, %s1801_s10  ;;  %s1805_s12 = sshll.u32 %s1920_s15, 4  ;;  %s1806_s12 = int_to_ptr.vmem [resolvable:$false] %s1805_s12 }
 0x381   : > { %s1807_s22 = scalar_lea.vmem %s1806_s12, 2048  ;;  %p1808_p5 = scmp.lt.s32.totalorder %s2366_s2, %s1806_s12 }
 0x382   : > { %p1803_p2 = pnand %p1802_p9, %p2055_p12  ;;  %p1809_p11 = scmp.lt.s32.totalorder %s1807_s22, %s1801_s10 }
 0x384   : > { %p1804_p0 = pneg %p1803_p2  ;;  %p1810_p1 = por %p1809_p11, %p1808_p5 }
 0x386   : > { %p1811_p4 = pnand %p1810_p1, %p1804_p0 }
 0x388   : > { %1814 = shalt.err (!%p1811_p4)
}
 0x389   : > { %s1815_s14 = scalar_lea.hbm %s2374_s29, 1024  ;;  %s1819_s23 = scalar_lea.hbm %s2509_s6, 2048 }
 0x38a   : > { %p1816_p6 = scmp.ne.s32.totalorder %s2374_s29, %s1815_s14  ;;  %p1820_p13 = scmp.lt.u32.totalorder %s2374_s29, %s2509_s6 }
 0x38b   : > { %p1821_p3 = scmp.lt.u32.totalorder %s1819_s23, %s1815_s14  ;;  %p1823_p9 = scmp.lt.u32.totalorder %s1815_s14, %s2374_s29 }
 0x38c   : > { %p1817_p8 = pnand %p1816_p6, %p2055_p12 }
 0x38d   : > { %p1822_p7 = por %p1821_p3, %p1820_p13 }
 0x38e   : > { %p1818_p10 = pneg %p1817_p8 }
 0x38f   : > { %p1824_p2 = por %p1823_p9, %p1822_p7 }
 0x391   : > { %p1825_p0 = pnand %p1824_p2, %p1818_p10 }
 0x393   : > { %1828 = shalt.err (!%p1825_p0)
}
 0x394   : > { %s2532_s11 = smov 8   ;;  %s2533_s10 = smov 128   ;;  %v1057_v18 = vpop.xlane.xlu1 %1056  ;;  %v930_v19 = vpop.xlane.xlu0 %929  ;;  %v944_v20 = vrot.slane %v2337_v48, %v2328_v45  ;;  %v1067_v21 = vrot.slane %v2378_v17, %v2328_v45  ;;  %v1071_v24 = vrot.slane %v2351_v0, %v2322_v43  ;;  %v956_v25 = vrot.slane %v2376_v16, %v2325_v5 }
 0x395   : > { %1512 = dma.vmem_to_hbm [thread:$0]  (%p2055_p12), %s2366_s2, 1024, %s2374_s29, %s2381_s16, %s2533_s10, %s2533_s10, %s2532_s11   ;;  %v949_v22 = vrot.slane %v930_v19, %v2322_v43  ;;  %v1076_v23 = vrot.slane %v1057_v18, %v2325_v5 }
 0x396   : > { %s2534_s15 = sshll.u32 %s2103_s18, 1  ;;  %v1072_v27 = vsel %vm950_vm1, %v1071_v24, %v1067_v21  ;;  %s2535_s16 = sshll.u32 %s1983_s28, 5 }
 0x397   : > { %v951_v10 = vsel %vm950_vm1, %v949_v22, %v944_v20  ;;  %s331_s29 = scalar_lea.vmem [#allocation7], %s2534_s15  ;;  %v1077_v28 = vsel %vm957_vm2, %v1076_v23, %v1072_v27  ;;  %s2453_s14 = scalar_lea.hbm %s2507_s4, %s2535_s16 }
 0x398   : > { %s1147_s2 = sshll.u32 %s331_s29, 4  ;;  %v934_v11 = vpop.xlane.xlu1 %933  ;;  %v1059_v26 = vpop.xlane.xlu0 %1058  ;;  %v958_v29 = vsel %vm957_vm2, %v956_v25, %v951_v10  ;;  %s1119_s21 = scalar_lea.sflag [#allocation4], %s2103_s18  ;;  %s2455_s2 = int_to_ptr.vmem [resolvable:$true] %s1147_s2 }
 0x399   : > { %v963_v58 = vrot.slane %v934_v11, %v2332_v54  ;;  %v1081_v57 = vrot.slane %v1059_v26, %v2332_v54  ;;  %s1829_s28 = scalar_lea.vmem %s2455_s2, 32  ;;  %s1921_s9 = smov [#allocation7]  }
 0x39a   : > { %p1830_p5 = scmp.ne.s32.totalorder %s2455_s2, %s1829_s28  ;;  %s1833_s23 = sshll.u32 %s1921_s9, 4  ;;  %s1834_s23 = int_to_ptr.vmem [resolvable:$false] %s1833_s23 }
 0x39b   : > { %v965_v30 = vsel %vm964_vm3, %v963_v58, %v958_v29  ;;  %v1082_v31 = vsel %vm964_vm3, %v1081_v57, %v1077_v28  ;;  %s1835_s17 = scalar_lea.vmem %s1834_s23, 64  ;;  %p1836_p4 = scmp.lt.s32.totalorder %s2455_s2, %s1834_s23 }
 0x39c   : > { %968 = vst.msk [vmem:[%s331_s29] sm:$0x1] %vm967_vm4, %v965_v30  ;;  %1084 = vst.msk [vmem:[%s331_s29 + $0x1] sm:$0x1] %vm967_vm4, %v1082_v31  ;;  %p1831_p11 = pnand %p1830_p5, %p2055_p12  ;;  %p1837_p6 = scmp.lt.s32.totalorder %s1835_s17, %s1829_s28 }
 0x39e   : > { %p1832_p1 = pneg %p1831_p11  ;;  %p1838_p8 = por %p1837_p6, %p1836_p4 }
 0x3a0   : > { %p1839_p10 = pnand %p1838_p8, %p1832_p1 }
 0x3a2   : > { %1842 = shalt.err (!%p1839_p10)
}
 0x3a3   : > { %s1843_s18 = scalar_lea.hbm %s2453_s14, 32  ;;  %s1847_s10 = scalar_lea.hbm %s2507_s4, 64 }
 0x3a4   : > { %p1844_p13 = scmp.ne.s32.totalorder %s2453_s14, %s1843_s18  ;;  %p1848_p9 = scmp.lt.u32.totalorder %s2453_s14, %s2507_s4 }
 0x3a5   : > { %p1849_p2 = scmp.lt.u32.totalorder %s1847_s10, %s1843_s18  ;;  %p1851_p5 = scmp.lt.u32.totalorder %s1843_s18, %s2453_s14 }
 0x3a6   : > { %p1845_p3 = pnand %p1844_p13, %p2055_p12 }
 0x3a7   : > { %p1850_p0 = por %p1849_p2, %p1848_p9 }
 0x3a8   : > { %p1846_p7 = pneg %p1845_p3 }
 0x3a9   : > { %p1852_p11 = por %p1851_p5, %p1850_p0 }
 0x3ab   : > { %p1853_p1 = pnand %p1852_p11, %p1846_p7 }
 0x3ad   : > { %1856 = shalt.err (!%p1853_p1)
}
 0x3ae   : > { %1510 = dma.vmem_to_hbm [thread:$0]  (%p2055_p12), %s2455_s2, 32, %s2453_s14, %s1119_s21  }
 0x3af PF: > { %s1206_s16 = sand.u32 1, %s1895_s24   ;;  %p2536_p4 = scmp.ne.s32.totalorder %s2521_s8, 0 }
 0x3b0   : > { %p2537_p6 = scmp.ge.s32.totalorder %s1907_s27, 2  ;;  %s1207_s12 = scalar_lea.sflag [#allocation4], %s1206_s16 }
 0x3b2   : > { %p1527_p8 = pnand %p2537_p6, %p2536_p4 }
 0x3b4   : > { %1882 = dma.done.wait (!%p1527_p8), %s1207_s12, 32  }
 0x3b5   : > { %1884 = vsyncadd (!%p1527_p8), %s1207_s12, 4294967264  ;;  %s2538_s22 = sadd.s32 4294967294, %s1907_s27  }
 0x3b6   : > { %s1215_s28 = sand.u32 1, %s2538_s22  }
 0x3b7   : > { %s1216_s9 = scalar_lea.sflag [#allocation9], %s1215_s28 }
 0x3b8   : > { %1886 = dma.done.wait (!%p1527_p8), %s1216_s9, 1056  }
 0x3b9   : > { %1888 = vsyncadd (!%p1527_p8), %s1216_s9, 4294966240  ;;  %s1234_s20 = scalar_lea.sflag [#allocation12], %s1206_s16 }
 0x3ba   : > { %1890 = dma.done.wait (!%p1527_p8), %s1234_s20, 1024  }
 0x3bb   : > { %1892 = vsyncadd (!%p1527_p8), %s1234_s20, 4294966272  ;;  %p28_p12 = scmp.ge.s32.totalorder %s2020_s13, 4   ;;  %s2539_s24 = smov %s1899_s25 }
 0x3bc   : > { %s2540_s25 = smov %s1903_s26  ;;  %s2541_s26 = smov %s2051_s19 }
 0x3bd   : > { %s2542_s27 = smov %s2020_s13  ;;  %30 = sbr.rel (!%p28_p12) target bundleno = 12 (0xc), region = 139 }
 0x3c4   :  { %1239 = vsyncpa [#allocation3], 1 }
 0x3c5   :  { %1241 = vsyncpa [#allocation3 + $0x1], 1 }
 0x3c6   :  { %1242 = vsyncpa [#allocation6], 1 }
 0x3c7   :  { %1243 = vsyncpa [#allocation4], 1 }
 0x3c8   :  { %1245 = vsyncpa [#allocation4 + $0x1], 1 }
 0x3c9   :  { %1246 = vsyncpa [#allocation9], 1 }
 0x3ca   :  { %1248 = vsyncpa [#allocation9 + $0x1], 1 }
 0x3cb   :  { %1249 = vsyncpa [#allocation12], 1 }
 0x3cc   :  { %1251 = vsyncpa [#allocation12 + $0x1], 1 }

</bundles_post_ra>
